<compile_context>
chip_gen: v7x
topology: tpu7x:2x2x1
jax: 0.10.0
libtpu: 0.0.40
codegen_flags: <defaults>
</compile_context>

<pallas_src>
import jax
import jax.numpy as jnp
from jax.experimental import pallas as pl
from jax.experimental.pallas import tpu as pltpu

LANE = 128


def _make_channel_attention_kernel(hw_true, hw_tile, needs_mask):
    inv_hw = 1.0 / float(hw_true)

    def kernel(x_ref, w1_ref, b1_ref, w2_ref, b2_ref, gate_ref, sum_acc, max_acc):
        k = pl.program_id(1)
        nk = pl.num_programs(1)

        x = x_ref[...]  # (1, C, hw_tile) float32

        if needs_mask:
            lane_idx = jax.lax.broadcasted_iota(jnp.int32, x.shape, 2)
            valid = (lane_idx + k * hw_tile) < hw_true
            x_for_max = jnp.where(valid, x, -jnp.inf)
        else:
            x_for_max = x

        # Fold tiles element-wise (VPU adds/maxes); cross-lane reduce only once at the end.
        @pl.when(k == 0)
        def _init():
            sum_acc[...] = x
            max_acc[...] = x_for_max

        @pl.when(k > 0)
        def _accumulate():
            sum_acc[...] = sum_acc[...] + x
            max_acc[...] = jnp.maximum(max_acc[...], x_for_max)

        @pl.when(k == nk - 1)
        def _finalize():
            avg_pool = jnp.sum(sum_acc[...], axis=-1) * jnp.float32(inv_hw)  # (1, C)
            max_pool = jnp.max(max_acc[...], axis=-1)                        # (1, C)
            pooled = jnp.concatenate([avg_pool, max_pool], axis=0)           # (2, C)

            # Shared bottleneck, run once for both pooled vectors.
            h = jnp.dot(pooled, w1_ref[...], preferred_element_type=jnp.float32) + b1_ref[...]
            h = jnp.maximum(h, 0.0)
            y = jnp.dot(h, w2_ref[...], preferred_element_type=jnp.float32) + b2_ref[...]  # (2, C)

            gate = jax.nn.sigmoid(y[0:1, :] + y[1:2, :])  # (1, C)
            gate_ref[...] = gate[None, :, :]              # (1, 1, C)

    return kernel


def _pick_hw_tile(hw, c):
    # Lane-aligned tile, capped so (2x double-buffered x tile + 2 scratch accumulators)
    # of f32 stays under ~12 MiB -> safe on v5e's 16 MiB default scoped VMEM and v7x's
    # 64 MiB physical VMEM.
    tile = min(2048, pl.cdiv(hw, LANE) * LANE)
    while tile > LANE and 4 * c * tile * 4 > 12 * 1024 * 1024:
        tile //= 2
    return max(LANE, (tile // LANE) * LANE)


def channel_attention_gate(x, w1, b1, w2, b2, *, hw_tile=None):
    """Returns the (B, C) sigmoid channel gate of the PyTorch ChannelAttention."""
    B, C, H, W = x.shape
    HW = H * W
    M = w1.shape[1]

    x_flat = x.reshape(B, C, HW).astype(jnp.float32)

    if hw_tile is None:
        hw_tile = _pick_hw_tile(HW, C)
    n_k = pl.cdiv(HW, hw_tile)
    hw_padded = n_k * hw_tile
    if hw_padded != HW:
        x_flat = jnp.pad(x_flat, ((0, 0), (0, 0), (0, hw_padded - HW)))

    kernel = _make_channel_attention_kernel(HW, hw_tile, hw_padded != HW)

    gate = pl.pallas_call(
        kernel,
        out_shape=jax.ShapeDtypeStruct((B, 1, C), jnp.float32),
        grid_spec=pltpu.PrefetchScalarGridSpec(
            num_scalar_prefetch=0,
            grid=(B, n_k),  # reduction (HW) axis last
            in_specs=[
                pl.BlockSpec((1, C, hw_tile), lambda b, k: (b, 0, k)),
                pl.BlockSpec((C, M), lambda b, k: (0, 0)),   # weights stay VMEM-resident
                pl.BlockSpec((1, M), lambda b, k: (0, 0)),
                pl.BlockSpec((M, C), lambda b, k: (0, 0)),
                pl.BlockSpec((1, C), lambda b, k: (0, 0)),
            ],
            out_specs=pl.BlockSpec((1, 1, C), lambda b, k: (b, 0, 0)),
            scratch_shapes=[
                pltpu.VMEM((1, C, hw_tile), jnp.float32),  # running sum
                pltpu.VMEM((1, C, hw_tile), jnp.float32),  # running max
            ],
        ),
        compiler_params=pltpu.CompilerParams(
            dimension_semantics=("parallel", "arbitrary"),
            vmem_limit_bytes=32 * 1024 * 1024,
        ),
    )(x_flat, w1, b1, w2, b2)

    return gate.reshape(B, C)


def channel_attention(x, w1, b1, w2, b2, *, hw_tile=None):
    """Matches PyTorch ChannelAttention.forward: gate broadcast to (B, C, H, W).

    The kernel only writes the (B, C) gate; the broadcast is done outside so XLA can fuse
    it into the downstream x * gate consumer instead of materializing redundant HBM traffic.
    """
    B, C, H, W = x.shape
    gate = channel_attention_gate(x, w1, b1, w2, b2, hw_tile=hw_tile)
    return jnp.broadcast_to(gate[:, :, None, None], (B, C, H, W))


def init_params(key, n_channels_in, reduction_ratio):
    """Deterministic init mimicking torch.nn.Linear default (uniform +-1/sqrt(fan_in))."""
    middle = int(n_channels_in / float(reduction_ratio))
    k1, k2, k3, k4 = jax.random.split(key, 4)
    lim1 = 1.0 / jnp.sqrt(jnp.float32(n_channels_in))
    lim2 = 1.0 / jnp.sqrt(jnp.float32(middle))
    # Stored transposed relative to torch so the kernel computes v @ w + b directly.
    w1 = jax.random.uniform(k1, (n_channels_in, middle), jnp.float32, -lim1, lim1)
    b1 = jax.random.uniform(k2, (1, middle), jnp.float32, -lim1, lim1)
    w2 = jax.random.uniform(k3, (middle, n_channels_in), jnp.float32, -lim2, lim2)
    b2 = jax.random.uniform(k4, (1, n_channels_in), jnp.float32, -lim2, lim2)
    return w1, b1, w2, b2


def reference(x, w1, b1, w2, b2):
    """Plain-JAX reference of the PyTorch forward for sanity checking."""
    B, C, H, W = x.shape
    avg_pool = jnp.mean(x, axis=(2, 3))
    max_pool = jnp.max(x, axis=(2, 3))

    def bottleneck(v):
        return jnp.maximum(v @ w1 + b1, 0.0) @ w2 + b2

    sig = jax.nn.sigmoid(bottleneck(avg_pool) + bottleneck(max_pool))
    return jnp.broadcast_to(sig[:, :, None, None], (B, C, H, W))


if __name__ == "__main__":
    key = jax.random.PRNGKey(0)
    k_x, k_p, k_x2 = jax.random.split(key, 3)

    B, C, H, W = 2, 4, 16, 16
    reduction_ratio = 2

    x = jax.random.normal(k_x, (B, C, H, W), jnp.float32)
    w1, b1, w2, b2 = init_params(k_p, C, reduction_ratio)

    # hw_tile=128 -> grid (B, 2): exercises the tiled, pipelined reduction path.
    out = jax.block_until_ready(channel_attention(x, w1, b1, w2, b2, hw_tile=128))
    ref = reference(x, w1, b1, w2, b2)
    assert out.shape == (B, C, H, W)
    assert jnp.allclose(out, ref, atol=1e-5, rtol=1e-5)

    # Non-multiple-of-128 spatial extent -> exercises zero-padding + -inf masking of the
    # last tile (inputs shifted negative to catch a bad max over padded zeros).
    x2 = jax.random.normal(k_x2, (B, C, 10, 13), jnp.float32) - 1.0
    out2 = jax.block_until_ready(channel_attention(x2, w1, b1, w2, b2, hw_tile=128))
    ref2 = reference(x2, w1, b1, w2, b2)
    assert jnp.allclose(out2, ref2, atol=1e-5, rtol=1e-5)

    print("KERNEL_OK")
</pallas_src>

<mosaic_0001>
module attributes {stable_mosaic.version = 11 : i64} {
  func.func @kernel(%arg0: i32, %arg1: i32, %arg2: memref<1x4x128xf32, #tpu.memory_space<vmem>>, %arg3: memref<4x2xf32, #tpu.memory_space<vmem>>, %arg4: memref<1x2xf32, #tpu.memory_space<vmem>>, %arg5: memref<2x4xf32, #tpu.memory_space<vmem>>, %arg6: memref<1x4xf32, #tpu.memory_space<vmem>>, %arg7: memref<1x1x4xf32, #tpu.memory_space<vmem>>, %arg8: memref<1x4x128xf32, #tpu.memory_space<vmem>>, %arg9: memref<1x4x128xf32, #tpu.memory_space<vmem>>) attributes {dimension_semantics = [#tpu.dimension_semantics<parallel>, #tpu.dimension_semantics<arbitrary>], iteration_bounds = array<i64: 2, 2>, scalar_prefetch = 0 : i64, scratch_operands = 2 : i64, tpu.core_type = #tpu.core_type<tc>, window_params = [{transform_indices = @transform_0, window_bounds = array<i64: 1, 4, 128>}, {pipeline_mode = #tpu.pipeline_mode<synchronous>, transform_indices = @transform_1, window_bounds = array<i64: 4, 2>}, {pipeline_mode = #tpu.pipeline_mode<synchronous>, transform_indices = @transform_2, window_bounds = array<i64: 1, 2>}, {pipeline_mode = #tpu.pipeline_mode<synchronous>, transform_indices = @transform_3, window_bounds = array<i64: 2, 4>}, {pipeline_mode = #tpu.pipeline_mode<synchronous>, transform_indices = @transform_4, window_bounds = array<i64: 1, 4>}, {transform_indices = @transform_5, window_bounds = array<i64: 1, 1, 4>}]} {
    %c0 = arith.constant 0 : index
    %c0_0 = arith.constant 0 : index
    %c0_1 = arith.constant 0 : index
    %0 = vector.load %arg2[%c0, %c0_0, %c0_1] : memref<1x4x128xf32, #tpu.memory_space<vmem>>, vector<1x4x128xf32>
    %c0_i32 = arith.constant 0 : i32
    %1 = arith.cmpi eq, %arg1, %c0_i32 : i32
    %2 = arith.extui %1 : i1 to i32
    %c0_i32_2 = arith.constant 0 : i32
    %3 = arith.cmpi ne, %2, %c0_i32_2 : i32
    scf.if %3 {
      %c0_6 = arith.constant 0 : index
      %c0_7 = arith.constant 0 : index
      %c0_8 = arith.constant 0 : index
      %10 = vector.load %arg8[%c0_6, %c0_7, %c0_8] : memref<1x4x128xf32, #tpu.memory_space<vmem>>, vector<1x4x128xf32>
      tpu.vector_store %arg8[%c0_6, %c0_7, %c0_8], %0 {strides = array<i32>} : memref<1x4x128xf32, #tpu.memory_space<vmem>>, vector<1x4x128xf32>,
      %c0_9 = arith.constant 0 : index
      %c0_10 = arith.constant 0 : index
      %c0_11 = arith.constant 0 : index
      %11 = vector.load %arg9[%c0_9, %c0_10, %c0_11] : memref<1x4x128xf32, #tpu.memory_space<vmem>>, vector<1x4x128xf32>
      tpu.vector_store %arg9[%c0_9, %c0_10, %c0_11], %0 {strides = array<i32>} : memref<1x4x128xf32, #tpu.memory_space<vmem>>, vector<1x4x128xf32>,
    } else {
    }
    %c0_i32_3 = arith.constant 0 : i32
    %4 = arith.cmpi sgt, %arg1, %c0_i32_3 : i32
    %5 = arith.extui %4 : i1 to i32
    %c0_i32_4 = arith.constant 0 : i32
    %6 = arith.cmpi ne, %5, %c0_i32_4 : i32
    scf.if %6 {
      %c0_6 = arith.constant 0 : index
      %c0_7 = arith.constant 0 : index
      %c0_8 = arith.constant 0 : index
      %10 = vector.load %arg8[%c0_6, %c0_7, %c0_8] : memref<1x4x128xf32, #tpu.memory_space<vmem>>, vector<1x4x128xf32>
      %11 = arith.addf %10, %0 : vector<1x4x128xf32>
      %c0_9 = arith.constant 0 : index
      %c0_10 = arith.constant 0 : index
      %c0_11 = arith.constant 0 : index
      %12 = vector.load %arg8[%c0_9, %c0_10, %c0_11] : memref<1x4x128xf32, #tpu.memory_space<vmem>>, vector<1x4x128xf32>
      tpu.vector_store %arg8[%c0_9, %c0_10, %c0_11], %11 {strides = array<i32>} : memref<1x4x128xf32, #tpu.memory_space<vmem>>, vector<1x4x128xf32>,
      %c0_12 = arith.constant 0 : index
      %c0_13 = arith.constant 0 : index
      %c0_14 = arith.constant 0 : index
      %13 = vector.load %arg9[%c0_12, %c0_13, %c0_14] : memref<1x4x128xf32, #tpu.memory_space<vmem>>, vector<1x4x128xf32>
      %14 = arith.maximumf %13, %0 : vector<1x4x128xf32>
      %c0_15 = arith.constant 0 : index
      %c0_16 = arith.constant 0 : index
      %c0_17 = arith.constant 0 : index
      %15 = vector.load %arg9[%c0_15, %c0_16, %c0_17] : memref<1x4x128xf32, #tpu.memory_space<vmem>>, vector<1x4x128xf32>
      tpu.vector_store %arg9[%c0_15, %c0_16, %c0_17], %14 {strides = array<i32>} : memref<1x4x128xf32, #tpu.memory_space<vmem>>, vector<1x4x128xf32>,
    } else {
    }
    %c1_i32 = arith.constant 1 : i32
    %7 = arith.cmpi eq, %arg1, %c1_i32 : i32
    %8 = arith.extui %7 : i1 to i32
    %c0_i32_5 = arith.constant 0 : i32
    %9 = arith.cmpi ne, %8, %c0_i32_5 : i32
    scf.if %9 {
      %c0_6 = arith.constant 0 : index
      %c0_7 = arith.constant 0 : index
      %c0_8 = arith.constant 0 : index
      %10 = vector.load %arg8[%c0_6, %c0_7, %c0_8] : memref<1x4x128xf32, #tpu.memory_space<vmem>>, vector<1x4x128xf32>
      %cst = arith.constant dense<0.000000e+00> : vector<1x4xf32>
      %11 = vector.multi_reduction <add>, %10, %cst [2] : vector<1x4x128xf32> to vector<1x4xf32>
      %cst_9 = arith.constant 3.906250e-03 : f32
      %12 = vector.broadcast %cst_9 : f32 to vector<1x4xf32>
      %13 = arith.mulf %11, %12 : vector<1x4xf32>
      %c0_10 = arith.constant 0 : index
      %c0_11 = arith.constant 0 : index
      %c0_12 = arith.constant 0 : index
      %14 = vector.load %arg9[%c0_10, %c0_11, %c0_12] : memref<1x4x128xf32, #tpu.memory_space<vmem>>, vector<1x4x128xf32>
      %cst_13 = arith.constant dense<0xFF800000> : vector<1x4xf32>
      %15 = vector.multi_reduction <maximumf>, %14, %cst_13 [2] : vector<1x4x128xf32> to vector<1x4xf32>
      %16 = tpu.concatenate %13, %15 in 0 : vector<1x4xf32>, vector<1x4xf32> -> vector<2x4xf32>
      %c0_14 = arith.constant 0 : index
      %c0_15 = arith.constant 0 : index
      %17 = vector.load %arg3[%c0_14, %c0_15] : memref<4x2xf32, #tpu.memory_space<vmem>>, vector<4x2xf32>
      %cst_16 = arith.constant dense<0.000000e+00> : vector<2x2xf32>
      %18 = tpu.matmul %16, %17, %cst_16 {dimension_numbers = #tpu.dot_dimension_numbers<[1], [0], [0], [1], [0, 0, 1, 1], [], []>} : vector<2x4xf32>, vector<4x2xf32>, vector<2x2xf32> -> vector<2x2xf32>
      %c0_17 = arith.constant 0 : index
      %c0_18 = arith.constant 0 : index
      %19 = vector.load %arg4[%c0_17, %c0_18] : memref<1x2xf32, #tpu.memory_space<vmem>>, vector<1x2xf32>
      %20 = vector.broadcast %19 : vector<1x2xf32> to vector<2x2xf32>
      %21 = arith.addf %18, %20 : vector<2x2xf32>
      %cst_19 = arith.constant 0.000000e+00 : f32
      %22 = vector.broadcast %cst_19 : f32 to vector<2x2xf32>
      %23 = arith.maximumf %21, %22 : vector<2x2xf32>
      %c0_20 = arith.constant 0 : index
      %c0_21 = arith.constant 0 : index
      %24 = vector.load %arg5[%c0_20, %c0_21] : memref<2x4xf32, #tpu.memory_space<vmem>>, vector<2x4xf32>
      %cst_22 = arith.constant dense<0.000000e+00> : vector<2x4xf32>
      %25 = tpu.matmul %23, %24, %cst_22 {dimension_numbers = #tpu.dot_dimension_numbers<[1], [0], [0], [1], [0, 0, 1, 1], [], []>} : vector<2x2xf32>, vector<2x4xf32>, vector<2x4xf32> -> vector<2x4xf32>
      %c0_23 = arith.constant 0 : index
      %c0_24 = arith.constant 0 : index
      %26 = vector.load %arg6[%c0_23, %c0_24] : memref<1x4xf32, #tpu.memory_space<vmem>>, vector<1x4xf32>
      %27 = vector.broadcast %26 : vector<1x4xf32> to vector<2x4xf32>
      %28 = arith.addf %25, %27 : vector<2x4xf32>
      %29 = vector.extract_strided_slice %28 {offsets = [0, 0], sizes = [1, 4], strides = [1, 1]} : vector<2x4xf32> to vector<1x4xf32>
      %30 = vector.extract_strided_slice %28 {offsets = [1, 0], sizes = [1, 4], strides = [1, 1]} : vector<2x4xf32> to vector<1x4xf32>
      %31 = arith.addf %29, %30 : vector<1x4xf32>
      %32 = arith.negf %31 : vector<1x4xf32>
      %33 = math.exp %32 : vector<1x4xf32>
      %cst_25 = arith.constant 1.000000e+00 : f32
      %34 = vector.broadcast %cst_25 : f32 to vector<1x4xf32>
      %35 = arith.addf %34, %33 : vector<1x4xf32>
      %36 = arith.divf %34, %35 : vector<1x4xf32>
      %37 = vector.shape_cast %36 : vector<1x4xf32> to vector<1x1x4xf32>
      %c0_26 = arith.constant 0 : index
      %c0_27 = arith.constant 0 : index
      %c0_28 = arith.constant 0 : index
      %38 = vector.load %arg7[%c0_26, %c0_27, %c0_28] : memref<1x1x4xf32, #tpu.memory_space<vmem>>, vector<1x1x4xf32>
      tpu.vector_store %arg7[%c0_26, %c0_27, %c0_28], %37 {strides = array<i32>} : memref<1x1x4xf32, #tpu.memory_space<vmem>>, vector<1x1x4xf32>,
    } else {
    }
    return
  }
  func.func @transform_0(%arg0: i32, %arg1: i32) -> (i32, i32, i32) {
    %c0_i32 = arith.constant 0 : i32
    %c0_i32_0 = arith.constant 0 : i32
    return %arg0, %c0_i32, %arg1 : i32, i32, i32
  }
  func.func @transform_1(%arg0: i32, %arg1: i32) -> (i32, i32) {
    %c0_i32 = arith.constant 0 : i32
    %c0_i32_0 = arith.constant 0 : i32
    %c0_i32_1 = arith.constant 0 : i32
    return %c0_i32, %c0_i32_0 : i32, i32
  }
  func.func @transform_2(%arg0: i32, %arg1: i32) -> (i32, i32) {
    %c0_i32 = arith.constant 0 : i32
    %c0_i32_0 = arith.constant 0 : i32
    %c0_i32_1 = arith.constant 0 : i32
    return %c0_i32, %c0_i32_0 : i32, i32
  }
  func.func @transform_3(%arg0: i32, %arg1: i32) -> (i32, i32) {
    %c0_i32 = arith.constant 0 : i32
    %c0_i32_0 = arith.constant 0 : i32
    %c0_i32_1 = arith.constant 0 : i32
    return %c0_i32, %c0_i32_0 : i32, i32
  }
  func.func @transform_4(%arg0: i32, %arg1: i32) -> (i32, i32) {
    %c0_i32 = arith.constant 0 : i32
    %c0_i32_0 = arith.constant 0 : i32
    %c0_i32_1 = arith.constant 0 : i32
    return %c0_i32, %c0_i32_0 : i32, i32
  }
  func.func @transform_5(%arg0: i32, %arg1: i32) -> (i32, i32, i32) {
    %c0_i32 = arith.constant 0 : i32
    %c0_i32_0 = arith.constant 0 : i32
    %c0_i32_1 = arith.constant 0 : i32
    return %arg0, %c0_i32, %c0_i32_0 : i32, i32, i32
  }
}

</mosaic_0001>

<bundles_post_ra>
// kernel: tpu_custom_call.1
= control target key start
LH: loop header
LB: loop body
LE: loop exit
PB: predicated region body
PF: predicated region fallthrough
CT: control target
= control target key end

     0   :  { %s1145_s0 = inlined_call_operand.hbm [shape: f32[2,4,256], index: 0, kind: input, shape index: {}]   ;;  %s1146_s1 = inlined_call_operand.vmem [shape: f32[4,2], index: 1, kind: input, shape index: {}]   ;;  %s1147_s2 = inlined_call_operand.vmem [shape: f32[1,2], index: 2, kind: input, shape index: {}]   ;;  %s1148_s3 = inlined_call_operand.vmem [shape: f32[2,4], index: 3, kind: input, shape index: {}]   ;;  %s1149_s4 = inlined_call_operand.vmem [shape: f32[1,4], index: 4, kind: input, shape index: {}]   ;;  %s1150_s5 = inlined_call_operand.hbm [shape: f32[2,1,4], index: 5, kind: output, shape index: {}]  }
   0x1   :  { %1155 = sst [smem:[#allocation13_spill]] %s1150_s5 }
   0x2   :  { %10 = vsyncpa [#allocation5], 0 }
   0x3   :  { %12 = vsyncpa [#allocation5 + $0x1], 0 }
   0x4   :  { %13 = vsyncpa [#allocation6], 0 }
   0x5   :  { %15 = vsyncpa [#allocation6 + $0x1], 0  ;;  %s910_s18 = smov 0   ;;  %s912_s19 = smov 0  }
   0x6   :  { %s914_s20 = smov 0   ;;  %s916_s21 = smov 0  }
   0x7   :  { %s918_s22 = smov 0   ;;  %s920_s23 = smov 0  }
   0x8   :  { %s922_s24 = smov 0   ;;  %s924_s25 = smov 0  }
   0x9   :  { %s926_s26 = smov 0   ;;  %s928_s27 = smov 0  }
   0xa   :  { %s930_s28 = smov 0  }
   0xb LB: > { %s578_s29 = sadd.s32 4294967295, %s874_s28   ;;  %s579_s30 = sadd.s32 4294967294, %s874_s28   ;;  %s874_s28 = sphi %s930_s28, %s21_s28   ;;  %s870_s27 = sphi %s928_s27, %s1181_s27   ;;  %s866_s26 = sphi %s926_s26, %s1180_s26   ;;  %s862_s25 = sphi %s924_s25, %s1179_s25   ;;  %s858_s24 = sphi %s922_s24, %s1178_s24   ;;  %s854_s23 = sphi %s920_s23, %s1177_s23   ;;  %s850_s22 = sphi %s918_s22, %s1176_s22   ;;  %s846_s21 = sphi %s916_s21, %s1175_s21   ;;  %s842_s20 = sphi %s914_s20, %s1174_s20   ;;  %s838_s19 = sphi %s912_s19, %s1173_s19   ;;  %s834_s18 = sphi %s910_s18, %s1172_s18  }
   0xc   : > { %s30_s6 = sadd.s32 1, %s866_s26  ;;  %s33_s7 = sadd.s32 1, %s870_s27 }
   0xd   : > { %p31_p0 = scmp.ge.s32.totalorder %s30_s6, 2  ;;  %s42_s8 = sadd.s32 1, %s854_s23 }
   0xe   : > { %p49_p1 = scmp.ne.s32.totalorder %s854_s23, %s850_s22  ;;  %p50_p2 = scmp.eq.s32.totalorder %s874_s28, 0 }
   0xf   : > { %s1183_s6 = smov (%p31_p0, %s30_s6), 0  ;;  %s1185_s7 = smov (!%p31_p0, %s33_s7), %s870_s27 }
  0x10   : > { %1156 = sst [smem:[#allocation10_spill]] %s1183_s6  ;;  %s38_s9 = ssub.s32 %s866_s26, %s1183_s6 }
  0x11   : > { %p976_p3 = por %p50_p2, %p49_p1  ;;  %p35_p4 = scmp.ge.s32.totalorder %s1185_s7, 2 }
  0x12   : > { %p55_p5 = scmp.ne.s32.totalorder %s850_s22, %s846_s21  ;;  %p56_p6 = scmp.eq.s32.totalorder %s578_s29, 0 }
  0x13   : > { %s152_s11 = sadd.s32 1, %s842_s20  ;;  %s1187_s7 = smov (%p35_p4, %s1185_s7), 0 }
  0x14   : > { %1158 = sst [smem:[#allocation11_spill]] %s1187_s7  ;;  %p984_p7 = por %p56_p6, %p55_p5 }
  0x15   : > { %p162_p8 = scmp.ne.s32.totalorder %s842_s20, %s838_s19  ;;  %s37_s13 = ssub.s32 %s870_s27, %s1187_s7 }
  0x16   : > { %p163_p9 = scmp.eq.s32.totalorder %s578_s29, 3  ;;  %s39_s14 = sor.u32 %s38_s9, %s37_s13 }
  0x17   : > { %p150_p10 = scmp.eq.s32.totalorder %s37_s13, 0  ;;  %p40_p11 = scmp.eq.s32.totalorder %s39_s14, 0 }
  0x18   : > { %p992_p12 = por %p163_p9, %p162_p8  ;;  %p168_p13 = scmp.ne.s32.totalorder %s838_s19, %s834_s18 }
  0x19   : > { %s997_s16 = scalar_select %p150_p10, %s842_s20, %s152_s11  }
  0x1a   : > { %s1160_s15 = scalar_select %p992_p12, 1, 0 }
  0x1b   : > { %s1000_s17 = scalar_select %p40_p11, %s854_s23, %s42_s8  }
  0x1c   : > { %p169_p0 = scmp.eq.s32.totalorder %s579_s30, 3  ;;  %p626_p1 = scmp.lt.s32.totalorder %s874_s28, 4 }
  0x1d   : > { %1161 = sst [smem:[#allocation12_spill]] %s1000_s17  ;;  %s201_s29 = sand.u32 1, %s854_s23  }
  0x1e   : > { %p1005_p2 = por %p169_p0, %p168_p13  ;;  %s582_s9 = sshll.u32 %s201_s29, 2 }
  0x1f   : > { %s583_s13 = sshll.u32 %s870_s27, 1  ;;  %s205_s7 = scalar_lea.vmem [#allocation4], %s582_s9 }
  0x20   : > { %s1162_s21 = scalar_select %p1005_p2, 1, 0 }
  0x21   : > { %s210_s14 = sadd.s32 %s866_s26, %s583_s13  ;;  %s214_s6 = sshll.u32 %s205_s7, 4  ;;  %s1012_s6 = int_to_ptr.vmem [resolvable:$true] %s214_s6 }
  0x22   : > { %s584_s5 = sshll.u32 %s210_s14, 6  ;;  %p1021_p4 = pnand %p626_p1, %p976_p3 }
  0x23   : > { %s1017_s17 = scalar_lea.hbm %s1145_s0, %s584_s5  ;;  %s202_s7 = scalar_lea.sflag [#allocation5], %s201_s29 }
  0x24   : > { %s722_s9 = scalar_lea.hbm %s1017_s17, 64  ;;  %p724_p9 = pneg %p1021_p4 }
  0x25   : > { %p723_p8 = scmp.ne.s32.totalorder %s1017_s17, %s722_s9  ;;  %s727_s13 = scalar_lea.hbm %s1145_s0, 256 }
  0x26   : > { %p728_p3 = scmp.lt.u32.totalorder %s1017_s17, %s1145_s0  ;;  %p729_p13 = scmp.lt.u32.totalorder %s727_s13, %s722_s9 }
  0x27   : > { %p725_p10 = pnand %p724_p9, %p723_p8  ;;  %p731_p1 = scmp.lt.u32.totalorder %s722_s9, %s1017_s17 }
  0x28   : > { %p730_p0 = por %p729_p13, %p728_p3 }
  0x29   : > { %p726_p11 = pneg %p725_p10 }
  0x2a   : > { %p732_p5 = por %p731_p1, %p730_p0 }
  0x2c   : > { %p733_p6 = pnand %p732_p5, %p726_p11 }
  0x2e   : > { %736 = shalt.err (!%p733_p6)
}
  0x2f   : > { %s737_s29 = scalar_lea.vmem %s1012_s6, 64  ;;  %s876_s8 = smov [#allocation4]  }
  0x30   : > { %p738_p8 = scmp.ne.s32.totalorder %s1012_s6, %s737_s29  ;;  %s742_s5 = sshll.u32 %s876_s8, 4  ;;  %s743_s5 = int_to_ptr.vmem [resolvable:$false] %s742_s5 }
  0x31   : > { %s744_s10 = scalar_lea.vmem %s743_s5, 128  ;;  %p745_p12 = scmp.lt.s32.totalorder %s1012_s6, %s743_s5 }
  0x32   : > { %p740_p10 = pnand %p738_p8, %p724_p9  ;;  %p746_p3 = scmp.lt.s32.totalorder %s744_s10, %s737_s29 }
  0x34   : > { %p741_p2 = pneg %p740_p10  ;;  %p747_p13 = por %p746_p3, %p745_p12 }
  0x36   : > { %p748_p0 = pnand %p747_p13, %p741_p2 }
  0x38   : > { %751 = shalt.err (!%p748_p0)
}
  0x39   : > { %621 = dma.hbm_to_vmem [thread:$0]  (!%p1021_p4), %s1017_s17, 64, %s1012_s6, %s202_s7  }
  0x3a   : > { %p1164_p5 = scmp.lt.s32.totalorder %s874_s28, 5  ;;  %p1165_p6 = scmp.ge.s32.totalorder %s874_s28, 1 }
  0x3c   : > { %p220_p9 = pnand %p1165_p6, %p1164_p5 }
  0x3d   : > { %s225_s9 = sand.u32 (!%p220_p9), 1, %s850_s22  }
  0x3e   : > { %223 = sbr.rel (%p220_p9) target bundleno = 728 (0x2d8), region = 40  ;;  %s586_s13 = sshll.u32 (!%p220_p9), %s225_s9, 2 }
  0x3f   : > { %s226_s14 = scalar_lea.sflag (!%p220_p9), [#allocation5], %s225_s9  ;;  %s229_s11 = scalar_lea.vmem (!%p220_p9), [#allocation4], %s586_s13 }
  0x45   : > { %825 = dma.done.wait (%p984_p7), %s226_s14, 64  }
  0x46   : > { %827 = vsyncadd (%p984_p7), %s226_s14, 4294967232  ;;  %s253_s30 = sand.u32 1, %s838_s19   ;;  %v255_v0 = vld [vmem:[%s229_s11] sm:$0xf]  ;;  %p587_p12 = scmp.ne.s32.totalorder %s858_s24, 0 }
  0x47   : > { %s1064_s6 = scalar_lea.vmem [#allocation7], %s253_s30  ;;  %260 = vst [vmem:[#allocation2] sm:$0xf] (!%p587_p12), %v255_v0  ;;  %261 = vst [vmem:[#allocation3] sm:$0xf] (!%p587_p12), %v255_v0 }
  0x48   : > { %259 = sbr.rel (%p587_p12) target bundleno = 79 (0x4f), region = 48 }
  0x4f PF: > { %p588_p2 = scmp.le.s32.totalorder %s858_s24, 0 }
  0x50   : > { %v266_v1 = vld [vmem:[#allocation2] sm:$0xf] (!%p588_p2)  ;;  %v269_v2 = vld [vmem:[#allocation3] sm:$0xf] (!%p588_p2) }
  0x51   : > { %265 = sbr.rel (%p588_p2) target bundleno = 88 (0x58), region = 52  ;;  %v267_v3 = vadd.f32 (!%p588_p2), %v266_v1, %v255_v0  ;;  %v270_v4 = vmax.f32 (!%p588_p2), %v269_v2, %v255_v0 }
  0x53   : > { %268 = vst [vmem:[#allocation2] sm:$0xf] (!%p588_p2), %v267_v3  ;;  %271 = vst [vmem:[#allocation3] sm:$0xf] (!%p588_p2), %v270_v4 }
  0x58 PF: > { %p589_p7 = scmp.ne.s32.totalorder %s858_s24, 1 }
  0x59   : > { %vm277_vm0 = vcmask (!%p589_p7), 1043456   ;;  %v302_v9 = vld [vmem:[%s1146_s1] sm:$0xf] (!%p589_p7)  ;;  %v877_v10 = vmov (!%p589_p7), 0.0   ;;  %vm878_vm1 = vmmov (!%p589_p7), 0   ;;  %v287_v11 = vlaneseq (!%p589_p7) }
  0x5a   : > { %275 = sbr.rel (%p589_p7) target bundleno = 702 (0x2be), region = 56  ;;  %v276_v5 = vld [vmem:[#allocation2] sm:$0xf] (!%p589_p7)  ;;  %v282_v6 = vld [vmem:[#allocation3] sm:$0xf] (!%p589_p7)  ;;  %604 = vmatprep.subr.mxu0 (!%p589_p7), %v877_v10  ;;  %606 = vmatprep.mubr.msk.f32.mxu0 (!%p589_p7), %vm878_vm1, %v877_v10  ;;  %vm300_vm2 = vcmask (!%p589_p7), 1040384  }
  0x5b   : > { %v278_v7 = vsel (!%p589_p7), %vm277_vm0, %v276_v5, 0.0  ;;  %v283_v8 = vsel (!%p589_p7), %vm277_vm0, %v282_v6, -inf  ;;  %605 = vmatpush3.msk.msra.mxu0 (!%p589_p7), %vm277_vm0, %v302_v9  ;;  %609 = vmatprep.subr.mxu1 (!%p589_p7), %v877_v10  ;;  %v288_v12 = vand.u32 (!%p589_p7), 127, %v287_v11  ;;  %v290_v13 = vshrl.u32 (!%p589_p7), %v287_v11, 7  ;;  %v388_v21 = vld [vmem:[%s1148_s3] sm:$0x3] (!%p589_p7) }
  0x5c   : > { %279 = vadd.xlane.f32.xlu0 (!%p589_p7), %v278_v7  ;;  %611 = vmatprep.mubr.msk.f32.mxu1 (!%p589_p7), %vm878_vm1, %v877_v10  ;;  %vm310_vm3 = vcmask (!%p589_p7), 31744   ;;  %vm400_vm4 = vcmask (!%p589_p7), 1041408   ;;  %v590_v22 = vld [vmem:[%s1147_s2] ss:$0 sm:$0xff] (!%p589_p7)  ;;  %vm396_vm5 = vcmask (!%p589_p7), 15360   ;;  %vm484_vm6 = vcmask (!%p589_p7), 24576  }
  0x5d   : > { %v291_v15 = vsub.s32 (!%p589_p7), %v288_v12, %v290_v13  ;;  %610 = vmatpush3.msk.msra.mxu1 (!%p589_p7), %vm400_vm4, %v388_v21  ;;  %v593_v27 = vld [vmem:[%s1149_s4] ss:$0 sm:$0xff] (!%p589_p7) }
  0x60   : > { %284 = vmax.xlane.f32.xlu0 (!%p589_p7), %v283_v8 }
  0xe9   : > { %v280_v14 = vpop.xlane.xlu0 %279 }
  0xea   : > { %v281_v16 = vmul.f32 0.00390625, %v280_v14 }
  0xec   : > { %v292_v18 = vrot.slane %v281_v16, %v291_v15 }
  0xed   : > { %v285_v17 = vpop.xlane.xlu0 %284 }
  0xee   : > { %v298_v19 = vrot.slane %v285_v17, %v291_v15 }
  0xf0   : > { %v301_v20 = vsel %vm300_vm2, %v292_v18, %v298_v19 }
  0xf1   : > { %607 = vmatmul.mubr.msk.f32.vlgmr.msra.gmra.mrb[0].mxu0 %vm310_vm3, %v301_v20 }
 0x1c4   : > { %v383_v23 = vpop.f32.mrb[0].mxu0 }
 0x1c5   : > { %v384_v24 = vadd.f32 %v590_v22, %v383_v23  ;;  %v608_v25 = vpop.f32.mrb[1].mxu0 }
 0x1c7   : > { %v387_v26 = vmax.f32 %v384_v24, 0.0 }
 0x1c9   : > { %612 = vmatmul.mubr.msk.f32.vlgmr.msra.gmra.mrb[0].mxu1 %vm396_vm5, %v387_v26 }
 0x29c   : > { %v470_v28 = vpop.f32.mrb[0].mxu1 }
 0x29d   : > { %v471_v29 = vadd.f32 %v593_v27, %v470_v28  ;;  %v613_v30 = vpop.f32.mrb[1].mxu1 }
 0x29f   : > { %v475_v31 = vrot.slane %v471_v29, 1 }
 0x2a1   : > { %v477_v32 = vadd.f32 %v475_v31, %v471_v29 }
 0x2a3   : > { %v596_v33 = vmul.f32 -1.442695, %v477_v32 }
 0x2a5   : > { %718 = vpow2.f32 %v596_v33 }
 0x2af   : > { %v719_v34 = vpop.eup %718 }
 0x2b0   : > { %v481_v35 = vadd.f32 1.0, %v719_v34 }
 0x2b2   : > { %720 = vrcp.f32 %v481_v35 }
 0x2bc   : > { %v721_v36 = vpop.eup %720 }
 0x2bd   : > { %485 = vst.msk [vmem:[%s1064_s6] sm:$0x1] %vm484_vm6, %v721_v36 }
 0x2be PF: > { %s597_s9 = sshll.u32 %s862_s25, 4  ;;  %s1166_s11 = sld [smem:[#allocation13_spill]] }
 0x2bf   : > { %s499_s17 = sshll.u32 %s1064_s6, 4  ;;  %s487_s24 = scalar_lea.sflag [#allocation6], %s253_s30  ;;  %s500_s17 = int_to_ptr.vmem [resolvable:$true] %s499_s17 }
 0x2c0   : > { %s752_s7 = scalar_lea.vmem %s500_s17, 16  ;;  %p1167_p11 = scmp.ne.s32.totalorder %s1160_s15, 0 }
 0x2c1   : > { %p753_p4 = scmp.ne.s32.totalorder %s500_s17, %s752_s7  ;;  %s879_s29 = smov [#allocation7]  }
 0x2c2   : > { %s756_s8 = sshll.u32 %s879_s29, 4  ;;  %s757_s8 = int_to_ptr.vmem [resolvable:$false] %s756_s8 }
 0x2c3   : > { %p754_p1 = pnand %p753_p4, %p1167_p11  ;;  %s758_s5 = scalar_lea.vmem %s757_s8, 32 }
 0x2c4   : > { %s1086_s12 = scalar_lea.hbm %s1166_s11, %s597_s9  ;;  %p759_p10 = scmp.lt.s32.totalorder %s500_s17, %s757_s8 }
 0x2c5   : > { %p755_p8 = pneg %p754_p1  ;;  %p760_p3 = scmp.lt.s32.totalorder %s758_s5, %s752_s7 }
 0x2c7   : > { %p761_p13 = por %p760_p3, %p759_p10 }
 0x2c9   : > { %p762_p0 = pnand %p761_p13, %p755_p8 }
 0x2cb   : > { %765 = shalt.err (!%p762_p0)
}
 0x2cc   : > { %s766_s25 = scalar_lea.hbm %s1086_s12, 16  ;;  %s770_s10 = scalar_lea.hbm %s1166_s11, 32 }
 0x2cd   : > { %p767_p5 = scmp.ne.s32.totalorder %s1086_s12, %s766_s25  ;;  %p771_p12 = scmp.lt.u32.totalorder %s1086_s12, %s1166_s11 }
 0x2ce   : > { %p772_p2 = scmp.lt.u32.totalorder %s770_s10, %s766_s25  ;;  %p774_p4 = scmp.lt.u32.totalorder %s766_s25, %s1086_s12 }
 0x2cf   : > { %p768_p6 = pnand %p767_p5, %p1167_p11 }
 0x2d0   : > { %p773_p7 = por %p772_p2, %p771_p12 }
 0x2d1   : > { %p769_p9 = pneg %p768_p6 }
 0x2d2   : > { %p775_p1 = por %p774_p4, %p773_p7 }
 0x2d4   : > { %p776_p8 = pnand %p775_p1, %p769_p9 }
 0x2d6   : > { %779 = shalt.err (!%p776_p8)
}
 0x2d7   : > { %616 = dma.vmem_to_hbm [thread:$0]  (%p1167_p11), %s500_s17, 16, %s1086_s12, %s487_s24  }
 0x2d8 PF: > { %p627_p10 = scmp.ge.s32.totalorder %s874_s28, 2  ;;  %s511_s14 = sand.u32 1, %s834_s18  }
 0x2d9   : > { %p1168_p3 = scmp.ne.s32.totalorder %s1162_s21, 0  ;;  %s512_s7 = scalar_lea.sflag [#allocation6], %s511_s14 }
 0x2db   : > { %p623_p13 = pnand %p627_p10, %p1168_p3 }
 0x2dd   : > { %829 = dma.done.wait (!%p623_p13), %s512_s7, 16  }
 0x2de   : > { %831 = vsyncadd (!%p623_p13), %s512_s7, 4294967280  ;;  %s21_s28 = sadd.s32 1, %s874_s28   ;;  %s1169_s15 = sld [smem:[#allocation12_spill]] }
 0x2df   : > { %p18_p0 = scmp.ge.s32.totalorder %s21_s28, 6   ;;  %s1170_s12 = sld [smem:[#allocation10_spill]] }
 0x2e0   : > { %s1171_s17 = sld [smem:[#allocation11_spill]]  ;;  %s1172_s18 = smov %s838_s19 }
 0x2e1   : > { %s1173_s19 = smov %s842_s20  ;;  %s1174_s20 = smov %s997_s16 }
 0x2e2   : > { %s1175_s21 = smov %s850_s22  ;;  %s1176_s22 = smov %s854_s23 }
 0x2e3   : > { %s1178_s24 = smov %s866_s26  ;;  %s1179_s25 = smov %s870_s27 }
 0x2e4   : > { %s1177_s23 = smov %s1169_s15  ;;  %20 = sbr.rel (!%p18_p0) target bundleno = 11 (0xb), region = 97 }
 0x2e5   : > { %s1180_s26 = smov %s1170_s12 }
 0x2e6   : > { %s1181_s27 = smov %s1171_s17 }
 0x2eb   :  { %516 = vsyncpa [#allocation5], 1 }
 0x2ec   :  { %518 = vsyncpa [#allocation5 + $0x1], 1 }
 0x2ed   :  { %519 = vsyncpa [#allocation6], 1 }
 0x2ee   :  { %521 = vsyncpa [#allocation6 + $0x1], 1 }

</bundles_post_ra>
